<compile_context>
chip_gen: v5e
topology: v5e:2x2
jax: 0.10.0
libtpu: 0.0.40
codegen_flags: <defaults>
</compile_context>

<pallas_src>
import functools

import jax
import jax.numpy as jnp
from jax.experimental import pallas as pl
from jax.experimental.pallas import tpu as pltpu

_LANE = 128


def _round_up(v, m):
    return (v + m - 1) // m * m


def _gnet_kernel(adj_ref, x_ref, w_ref, b_ref, o_ref, *, layer_dims):
    # adj_ref: (G, N, N)        per-graph normalized adjacency
    # x_ref:   (G, N, Fpad)     node features, zero-padded to lane width
    # w_ref:   (L, Fpad, Fpad)  stacked, zero-padded weights (shared)
    # b_ref:   (L, 1, Fpad)     stacked, zero-padded biases (shared)
    # o_ref:   (G, N, Fpad)
    adj = adj_ref[...].astype(jnp.float32)
    h = x_ref[...].astype(jnp.float32)

    for layer, (fin, fout) in enumerate(layer_dims):
        w = w_ref[layer]                # (Fpad, Fpad)
        b = b_ref[layer][None]          # (1, 1, Fpad) -> broadcasts over (G, N)
        if fout < fin:
            # Project features first so the N x N contraction runs on the
            # smaller feature width (first-order FLOP saving for large N).
            hw = jnp.einsum("gnf,fo->gno", h, w,
                            preferred_element_type=jnp.float32)
            y = jnp.einsum("gnm,gmo->gno", adj, hw,
                           preferred_element_type=jnp.float32)
        else:
            ah = jnp.einsum("gnm,gmf->gnf", adj, h,
                            preferred_element_type=jnp.float32)
            y = jnp.einsum("gnf,fo->gno", ah, w,
                           preferred_element_type=jnp.float32)
        h = jnp.maximum(y + b, 0.0)

    o_ref[...] = h.astype(o_ref.dtype)


def _choose_graphs_per_block(batch, n, fpad, num_layers, itemsize=4,
                             vmem_budget=12 * 1024 * 1024):
    """Largest divisor of `batch` that (a) keeps >=2 grid steps when possible
    (v7x megacore) and (b) keeps double-buffered blocks well under the
    scoped-VMEM default on every chip."""
    fixed = 2 * num_layers * (fpad * fpad + fpad) * itemsize        # W + b
    per_graph = 2 * (n * n + 2 * n * fpad) * itemsize               # adj + x + out
    cap = max(1, (vmem_budget - fixed) // max(per_graph, 1))
    target = max(1, min(batch // 2, cap))
    for g in range(int(target), 0, -1):
        if batch % g == 0:
            return g
    return 1


def gnetwork_forward(x, adj, params, graphs_per_block=None):
    """Forward pass of GNetwork: all GCN layers fused into one pallas_call."""
    B, N, fin0 = x.shape
    dims = [int(fin0)] + [int(w.shape[1]) for (w, _) in params]
    num_layers = len(params)
    fpad = _round_up(max(dims), _LANE)

    # Lane-dense, zero-padded layouts (padding stays exactly zero end-to-end).
    x_p = jnp.pad(x, ((0, 0), (0, 0), (0, fpad - fin0)))
    w_stack = jnp.stack([
        jnp.pad(w, ((0, fpad - w.shape[0]), (0, fpad - w.shape[1])))
        for (w, _) in params])                                   # (L, Fpad, Fpad)
    b_stack = jnp.stack([
        jnp.pad(b, ((0, 0), (0, fpad - b.shape[1])))
        for (_, b) in params])                                   # (L, 1, Fpad)

    if graphs_per_block is None:
        graphs_per_block = _choose_graphs_per_block(B, N, fpad, num_layers)
    g = int(graphs_per_block)
    assert B % g == 0, "graphs_per_block must divide the batch"
    grid = (B // g,)

    layer_dims = tuple(zip(dims[:-1], dims[1:]))
    kernel = functools.partial(_gnet_kernel, layer_dims=layer_dims)

    out = pl.pallas_call(
        kernel,
        out_shape=jax.ShapeDtypeStruct((B, N, fpad), x.dtype),
        grid_spec=pltpu.PrefetchScalarGridSpec(
            num_scalar_prefetch=0,
            grid=grid,
            in_specs=[
                pl.BlockSpec((g, N, N), lambda i: (i, 0, 0)),          # adj
                pl.BlockSpec((g, N, fpad), lambda i: (i, 0, 0)),       # x (padded)
                pl.BlockSpec((num_layers, fpad, fpad),
                             lambda i: (0, 0, 0)),                     # W stack (shared)
                pl.BlockSpec((num_layers, 1, fpad),
                             lambda i: (0, 0, 0)),                     # b stack (shared)
            ],
            out_specs=pl.BlockSpec((g, N, fpad), lambda i: (i, 0, 0)),
        ),
        compiler_params=pltpu.CompilerParams(
            dimension_semantics=("parallel",)),
    )(adj, x_p, w_stack, b_stack)

    return out[..., :dims[-1]]


gnetwork_forward_jit = jax.jit(gnetwork_forward,
                               static_argnames=("graphs_per_block",))


def init_gnetwork_params(key, input_dim, output_dim, hidden_dim, num_layers,
                         dtype=jnp.float32):
    """Deterministic parameter init matching GNetwork's layer shapes."""
    dims = [input_dim] + [hidden_dim] * (num_layers - 1) + [output_dim]
    params = []
    for i in range(num_layers):
        fin, fout = dims[i], dims[i + 1]
        key, wk, bk = jax.random.split(key, 3)
        scale = 1.0 / jnp.sqrt(jnp.asarray(fin, dtype))
        w = jax.random.uniform(wk, (fin, fout), dtype, -scale, scale)
        b = jax.random.uniform(bk, (1, fout), dtype, -scale, scale)
        params.append((w, b))
    return params


if __name__ == "__main__":
    # Small, module-consistent shapes.
    B, N = 2, 8               # 2 graphs, 8 nodes each
    input_dim, hidden_dim, output_dim = 4, 32, 4
    num_layers = 3            # input layer + 1 hidden layer + output layer

    key = jax.random.PRNGKey(0)
    kx, ka, kp = jax.random.split(key, 3)

    x = jax.random.normal(kx, (B, N, input_dim), jnp.float32)

    # Build a symmetric, row-normalized adjacency (self-loops included).
    raw = jax.random.uniform(ka, (B, N, N), jnp.float32)
    a = (raw + jnp.swapaxes(raw, 1, 2)) > 1.0
    a = a.astype(jnp.float32) + jnp.eye(N, dtype=jnp.float32)[None]
    deg = jnp.sum(a, axis=-1, keepdims=True)
    adj = a / deg

    params = init_gnetwork_params(kp, input_dim, output_dim, hidden_dim,
                                  num_layers)

    out = gnetwork_forward_jit(x, adj, params)
    jax.block_until_ready(out)

    # Pure-JAX reference check (ReLU on every layer, per GCNLayer assumption).
    ref = x
    for (w, b) in params:
        ref = jnp.maximum(jnp.einsum("bnm,bmf->bnf", adj, ref) @ w + b, 0.0)

    assert out.shape == (B, N, output_dim)
    assert jnp.allclose(out, ref, atol=1e-5, rtol=1e-5)

    print("KERNEL_OK")
</pallas_src>

<mosaic_0001>
module attributes {stable_mosaic.version = 11 : i64} {
  func.func @_gnet_kernel(%arg0: i32, %arg1: memref<1x8x8xf32, #tpu.memory_space<vmem>>, %arg2: memref<1x8x128xf32, #tpu.memory_space<vmem>>, %arg3: memref<3x128x128xf32, #tpu.memory_space<vmem>>, %arg4: memref<3x1x128xf32, #tpu.memory_space<vmem>>, %arg5: memref<1x8x128xf32, #tpu.memory_space<vmem>>) attributes {dimension_semantics = [#tpu.dimension_semantics<parallel>], iteration_bounds = array<i64: 2>, scalar_prefetch = 0 : i64, scratch_operands = 0 : i64, tpu.core_type = #tpu.core_type<tc>, window_params = [{transform_indices = @transform_0, window_bounds = array<i64: 1, 8, 8>}, {transform_indices = @transform_1, window_bounds = array<i64: 1, 8, 128>}, {pipeline_mode = #tpu.pipeline_mode<synchronous>, transform_indices = @transform_2, window_bounds = array<i64: 3, 128, 128>}, {pipeline_mode = #tpu.pipeline_mode<synchronous>, transform_indices = @transform_3, window_bounds = array<i64: 3, 1, 128>}, {transform_indices = @transform_4, window_bounds = array<i64: 1, 8, 128>}]} {
    %c0 = arith.constant 0 : index
    %c0_0 = arith.constant 0 : index
    %c0_1 = arith.constant 0 : index
    %0 = vector.load %arg1[%c0, %c0_0, %c0_1] : memref<1x8x8xf32, #tpu.memory_space<vmem>>, vector<1x8x8xf32>
    %c0_2 = arith.constant 0 : index
    %c0_3 = arith.constant 0 : index
    %c0_4 = arith.constant 0 : index
    %1 = vector.load %arg2[%c0_2, %c0_3, %c0_4] : memref<1x8x128xf32, #tpu.memory_space<vmem>>, vector<1x8x128xf32>
    %c0_5 = arith.constant 0 : index
    %c0_6 = arith.constant 0 : index
    %c0_7 = arith.constant 0 : index
    %2 = vector.load %arg3[%c0_5, %c0_6, %c0_7] : memref<3x128x128xf32, #tpu.memory_space<vmem>>, vector<1x128x128xf32>
    %3 = vector.shape_cast %2 : vector<1x128x128xf32> to vector<128x128xf32>
    %c0_8 = arith.constant 0 : index
    %c0_9 = arith.constant 0 : index
    %c0_10 = arith.constant 0 : index
    %4 = vector.load %arg4[%c0_8, %c0_9, %c0_10] : memref<3x1x128xf32, #tpu.memory_space<vmem>>, vector<1x1x128xf32>
    %5 = vector.shape_cast %4 : vector<1x1x128xf32> to vector<1x128xf32>
    %6 = vector.shape_cast %5 : vector<1x128xf32> to vector<1x1x128xf32>
    "tpu.trace_start"() <{level = 10 : i32, message = "gnm,gmf->gnf"}> : () -> ()
    %cst = arith.constant dense<0.000000e+00> : vector<1x8x128xf32>
    %7 = tpu.matmul %0, %1, %cst {dimension_numbers = #tpu.dot_dimension_numbers<[2], [1], [1], [2], [0, 0, 0, 1, 1, 2], [0], [0]>} : vector<1x8x8xf32>, vector<1x8x128xf32>, vector<1x8x128xf32> -> vector<1x8x128xf32>
    "tpu.trace_stop"() : () -> ()
    "tpu.trace_start"() <{level = 10 : i32, message = "gnf,fo->gno"}> : () -> ()
    %cst_11 = arith.constant dense<0.000000e+00> : vector<1x8x128xf32>
    %8 = tpu.matmul %7, %3, %cst_11 {dimension_numbers = #tpu.dot_dimension_numbers<[2], [0], [0, 1], [1], [0, 0, 0, 1, 1, 1], [], []>} : vector<1x8x128xf32>, vector<128x128xf32>, vector<1x8x128xf32> -> vector<1x8x128xf32>
    "tpu.trace_stop"() : () -> ()
    %9 = vector.broadcast %6 : vector<1x1x128xf32> to vector<1x8x128xf32>
    %10 = arith.addf %8, %9 : vector<1x8x128xf32>
    %cst_12 = arith.constant 0.000000e+00 : f32
    %11 = vector.broadcast %cst_12 : f32 to vector<1x8x128xf32>
    %12 = arith.maximumf %10, %11 : vector<1x8x128xf32>
    %c1 = arith.constant 1 : index
    %c0_13 = arith.constant 0 : index
    %c0_14 = arith.constant 0 : index
    %13 = vector.load %arg3[%c1, %c0_13, %c0_14] : memref<3x128x128xf32, #tpu.memory_space<vmem>>, vector<1x128x128xf32>
    %14 = vector.shape_cast %13 : vector<1x128x128xf32> to vector<128x128xf32>
    %c1_15 = arith.constant 1 : index
    %c0_16 = arith.constant 0 : index
    %c0_17 = arith.constant 0 : index
    %15 = vector.load %arg4[%c1_15, %c0_16, %c0_17] : memref<3x1x128xf32, #tpu.memory_space<vmem>>, vector<1x1x128xf32>
    %16 = vector.shape_cast %15 : vector<1x1x128xf32> to vector<1x128xf32>
    %17 = vector.shape_cast %16 : vector<1x128xf32> to vector<1x1x128xf32>
    "tpu.trace_start"() <{level = 10 : i32, message = "gnm,gmf->gnf"}> : () -> ()
    %cst_18 = arith.constant dense<0.000000e+00> : vector<1x8x128xf32>
    %18 = tpu.matmul %0, %12, %cst_18 {dimension_numbers = #tpu.dot_dimension_numbers<[2], [1], [1], [2], [0, 0, 0, 1, 1, 2], [0], [0]>} : vector<1x8x8xf32>, vector<1x8x128xf32>, vector<1x8x128xf32> -> vector<1x8x128xf32>
    "tpu.trace_stop"() : () -> ()
    "tpu.trace_start"() <{level = 10 : i32, message = "gnf,fo->gno"}> : () -> ()
    %cst_19 = arith.constant dense<0.000000e+00> : vector<1x8x128xf32>
    %19 = tpu.matmul %18, %14, %cst_19 {dimension_numbers = #tpu.dot_dimension_numbers<[2], [0], [0, 1], [1], [0, 0, 0, 1, 1, 1], [], []>} : vector<1x8x128xf32>, vector<128x128xf32>, vector<1x8x128xf32> -> vector<1x8x128xf32>
    "tpu.trace_stop"() : () -> ()
    %20 = vector.broadcast %17 : vector<1x1x128xf32> to vector<1x8x128xf32>
    %21 = arith.addf %19, %20 : vector<1x8x128xf32>
    %cst_20 = arith.constant 0.000000e+00 : f32
    %22 = vector.broadcast %cst_20 : f32 to vector<1x8x128xf32>
    %23 = arith.maximumf %21, %22 : vector<1x8x128xf32>
    %c2 = arith.constant 2 : index
    %c0_21 = arith.constant 0 : index
    %c0_22 = arith.constant 0 : index
    %24 = vector.load %arg3[%c2, %c0_21, %c0_22] : memref<3x128x128xf32, #tpu.memory_space<vmem>>, vector<1x128x128xf32>
    %25 = vector.shape_cast %24 : vector<1x128x128xf32> to vector<128x128xf32>
    %c2_23 = arith.constant 2 : index
    %c0_24 = arith.constant 0 : index
    %c0_25 = arith.constant 0 : index
    %26 = vector.load %arg4[%c2_23, %c0_24, %c0_25] : memref<3x1x128xf32, #tpu.memory_space<vmem>>, vector<1x1x128xf32>
    %27 = vector.shape_cast %26 : vector<1x1x128xf32> to vector<1x128xf32>
    %28 = vector.shape_cast %27 : vector<1x128xf32> to vector<1x1x128xf32>
    "tpu.trace_start"() <{level = 10 : i32, message = "gnf,fo->gno"}> : () -> ()
    %cst_26 = arith.constant dense<0.000000e+00> : vector<1x8x128xf32>
    %29 = tpu.matmul %23, %25, %cst_26 {dimension_numbers = #tpu.dot_dimension_numbers<[2], [0], [0, 1], [1], [0, 0, 0, 1, 1, 1], [], []>} : vector<1x8x128xf32>, vector<128x128xf32>, vector<1x8x128xf32> -> vector<1x8x128xf32>
    "tpu.trace_stop"() : () -> ()
    "tpu.trace_start"() <{level = 10 : i32, message = "gnm,gmo->gno"}> : () -> ()
    %cst_27 = arith.constant dense<0.000000e+00> : vector<1x8x128xf32>
    %30 = tpu.matmul %0, %29, %cst_27 {dimension_numbers = #tpu.dot_dimension_numbers<[2], [1], [1], [2], [0, 0, 0, 1, 1, 2], [0], [0]>} : vector<1x8x8xf32>, vector<1x8x128xf32>, vector<1x8x128xf32> -> vector<1x8x128xf32>
    "tpu.trace_stop"() : () -> ()
    %31 = vector.broadcast %28 : vector<1x1x128xf32> to vector<1x8x128xf32>
    %32 = arith.addf %30, %31 : vector<1x8x128xf32>
    %cst_28 = arith.constant 0.000000e+00 : f32
    %33 = vector.broadcast %cst_28 : f32 to vector<1x8x128xf32>
    %34 = arith.maximumf %32, %33 : vector<1x8x128xf32>
    %c0_29 = arith.constant 0 : index
    %c0_30 = arith.constant 0 : index
    %c0_31 = arith.constant 0 : index
    %35 = vector.load %arg5[%c0_29, %c0_30, %c0_31] : memref<1x8x128xf32, #tpu.memory_space<vmem>>, vector<1x8x128xf32>
    tpu.vector_store %arg5[%c0_29, %c0_30, %c0_31], %34 {strides = array<i32>} : memref<1x8x128xf32, #tpu.memory_space<vmem>>, vector<1x8x128xf32>,
    return
  }
  func.func @transform_0(%arg0: i32) -> (i32, i32, i32) {
    %c0_i32 = arith.constant 0 : i32
    %c0_i32_0 = arith.constant 0 : i32
    %c0_i32_1 = arith.constant 0 : i32
    return %arg0, %c0_i32, %c0_i32_0 : i32, i32, i32
  }
  func.func @transform_1(%arg0: i32) -> (i32, i32, i32) {
    %c0_i32 = arith.constant 0 : i32
    %c0_i32_0 = arith.constant 0 : i32
    %c0_i32_1 = arith.constant 0 : i32
    return %arg0, %c0_i32, %c0_i32_0 : i32, i32, i32
  }
  func.func @transform_2(%arg0: i32) -> (i32, i32, i32) {
    %c0_i32 = arith.constant 0 : i32
    %c0_i32_0 = arith.constant 0 : i32
    %c0_i32_1 = arith.constant 0 : i32
    %c0_i32_2 = arith.constant 0 : i32
    return %c0_i32, %c0_i32_0, %c0_i32_1 : i32, i32, i32
  }
  func.func @transform_3(%arg0: i32) -> (i32, i32, i32) {
    %c0_i32 = arith.constant 0 : i32
    %c0_i32_0 = arith.constant 0 : i32
    %c0_i32_1 = arith.constant 0 : i32
    %c0_i32_2 = arith.constant 0 : i32
    return %c0_i32, %c0_i32_0, %c0_i32_1 : i32, i32, i32
  }
  func.func @transform_4(%arg0: i32) -> (i32, i32, i32) {
    %c0_i32 = arith.constant 0 : i32
    %c0_i32_0 = arith.constant 0 : i32
    %c0_i32_1 = arith.constant 0 : i32
    return %arg0, %c0_i32, %c0_i32_0 : i32, i32, i32
  }
}

</mosaic_0001>

<bundles_post_ra>
// kernel: gnetwork_forward.1
= control target key start
LH: loop header
LB: loop body
LE: loop exit
PB: predicated region body
PF: predicated region fallthrough
CT: control target
= control target key end

     0   :  { %s560_s15 = smov 0   ;;  %s746_s0 = inlined_call_operand.vmem [shape: f32[2,8,8], index: 0, kind: input, shape index: {}]   ;;  %s747_s1 = inlined_call_operand.vmem [shape: f32[2,8,128], index: 1, kind: input, shape index: {}]   ;;  %s748_s2 = inlined_call_operand.vmem [shape: f32[3,128,128], index: 2, kind: input, shape index: {}]   ;;  %s749_s3 = inlined_call_operand.vmem [shape: f32[3,1,128], index: 3, kind: input, shape index: {}]   ;;  %s750_s4 = inlined_call_operand.vmem [shape: f32[2,8,128], index: 4, kind: output, shape index: {}]  }
   0x1 LB: > { %s469_s16 = sadd.s32 4294967295, %s533_s15   ;;  %p473_p0 = scmp.ge.s32.totalorder %s533_s15, 1  ;;  %s533_s15 = sphi %s560_s15, %s14_s15  }
   0x2   : > { %p170_p1 = scmp.lt.s32.totalorder %s533_s15, 3 }
   0x4   : > { %p171_p2 = pnand %p473_p0, %p170_p1 }
   0x5   : > { %p198_p3 = scmp.lt.s32.totalorder (!%p171_p2), %s469_s16, 1 }
   0x6   : > { %174 = sbr.rel (%p171_p2) target bundleno = 811 (0x32b), region = 36 }
   0xb   : > { %v227_v0 = vld [vmem:[%s748_s2 + $0x78] sm:$0xff]  ;;  %v226_v1 = vld [vmem:[%s748_s2 + $0x70] sm:$0xff]  ;;  %s752_s16 = smov (!%p198_p3, %s469_s16), 1  ;;  %v225_v2 = vld [vmem:[%s748_s2 + $0x68] sm:$0xff]  ;;  %vm229_vm0 = vcmask 64512  }
   0xc   : > { %256 = vmatpush.msra.mxu1 %v227_v0  ;;  %s577_s23 = sshll.u32 %s752_s16, 3  ;;  %v224_v3 = vld [vmem:[%s748_s2 + $0x60] sm:$0xff]  ;;  %v223_v6 = vld [vmem:[%s748_s2 + $0x58] sm:$0xff]  ;;  %v222_v7 = vld [vmem:[%s748_s2 + $0x50] sm:$0xff] }
   0xd   : > { %s205_s28 = scalar_lea.vmem %s747_s1, %s577_s23  ;;  %s201_s5 = scalar_lea.vmem %s746_s0, %s577_s23  ;;  %v221_v8 = vld [vmem:[%s748_s2 + $0x48] sm:$0xff]  ;;  %v220_v9 = vld [vmem:[%s748_s2 + $0x40] sm:$0xff]  ;;  %v219_v10 = vld [vmem:[%s748_s2 + $0x38] sm:$0xff] }
   0xe   : > { %257 = vmatpush.msra.mxu1 %v226_v1  ;;  %v211_v4 = vld [vmem:[%s205_s28] sm:$0xff]  ;;  %v218_v11 = vld [vmem:[%s748_s2 + $0x30] sm:$0xff]  ;;  %v217_v12 = vld [vmem:[%s748_s2 + $0x28] sm:$0xff]  ;;  %s209_s6 = scalar_lea.vmem %s750_s4, %s577_s23 }
   0xf   : > { %v590_v5 = vld [vmem:[%s201_s5] sm:$0xff]  ;;  %248 = vmatpush.msra.mxu2 %v211_v4  ;;  %v215_v14 = vld [vmem:[%s748_s2 + $0x18] sm:$0xff]  ;;  %v214_v15 = vld [vmem:[%s748_s2 + $0x10] sm:$0xff] }
  0x10   : > { %258 = vmatpush.msra.mxu1 %v225_v2  ;;  %477 = vmatmul.msk.f32.vlgmr.msra.gmra.mxu2 %vm229_vm0, %v590_v5  ;;  %v216_v13 = vld [vmem:[%s748_s2 + $0x20] sm:$0xff]  ;;  %v213_v16 = vld [vmem:[%s748_s2 + $0x8] sm:$0xff]  ;;  %v493_v19 = vld [vmem:[%s748_s2 + $0xf8] sm:$0xff] }
  0x11   : > { %v212_v17 = vld [vmem:[%s748_s2] sm:$0xff]  ;;  %v492_v20 = vld [vmem:[%s748_s2 + $0xf0] sm:$0xff]  ;;  %319 = vmatpush.msra.mxu3 %v493_v19  ;;  %v491_v21 = vld [vmem:[%s748_s2 + $0xe8] sm:$0xff] }
  0x12   : > { %259 = vmatpush.msra.mxu1 %v224_v3  ;;  %v490_v22 = vld [vmem:[%s748_s2 + $0xe0] sm:$0xff]  ;;  %v489_v23 = vld [vmem:[%s748_s2 + $0xd8] sm:$0xff]  ;;  %v488_v24 = vld [vmem:[%s748_s2 + $0xd0] sm:$0xff] }
  0x13   : > { %320 = vmatpush.msra.mxu3 %v492_v20  ;;  %v487_v25 = vld [vmem:[%s748_s2 + $0xc8] sm:$0xff]  ;;  %v486_v26 = vld [vmem:[%s748_s2 + $0xc0] sm:$0xff]  ;;  %v485_v27 = vld [vmem:[%s748_s2 + $0xb8] sm:$0xff] }
  0x14   : > { %260 = vmatpush.msra.mxu1 %v223_v6  ;;  %v484_v28 = vld [vmem:[%s748_s2 + $0xb0] sm:$0xff]  ;;  %v483_v29 = vld [vmem:[%s748_s2 + $0xa8] sm:$0xff]  ;;  %v482_v30 = vld [vmem:[%s748_s2 + $0xa0] sm:$0xff] }
  0x15   : > { %321 = vmatpush.msra.mxu3 %v491_v21  ;;  %v481_v31 = vld [vmem:[%s748_s2 + $0x98] sm:$0xff]  ;;  %v524_v32 = vld [vmem:[%s749_s3] ss:$0 sm:$0xff]  ;;  %v480_v33 = vld [vmem:[%s748_s2 + $0x90] sm:$0xff] }
  0x16   : > { %261 = vmatpush.msra.mxu1 %v222_v7  ;;  %v479_v35 = vld [vmem:[%s748_s2 + $0x88] sm:$0xff]  ;;  %v478_v38 = vld [vmem:[%s748_s2 + $0x80] sm:$0xff]  ;;  %v511_v39 = vld [vmem:[%s748_s2 + $0x178] sm:$0xff] }
  0x17   : > { %322 = vmatpush.msra.mxu3 %v490_v22  ;;  %v510_v40 = vld [vmem:[%s748_s2 + $0x170] sm:$0xff]  ;;  %359 = vmatpush.msra.mxu0 %v511_v39  ;;  %v509_v41 = vld [vmem:[%s748_s2 + $0x168] sm:$0xff]  ;;  %v508_v42 = vld [vmem:[%s748_s2 + $0x160] sm:$0xff] }
  0x18   : > { %262 = vmatpush.msra.mxu1 %v221_v8  ;;  %v507_v43 = vld [vmem:[%s748_s2 + $0x158] sm:$0xff]  ;;  %v506_v44 = vld [vmem:[%s748_s2 + $0x150] sm:$0xff]  ;;  %v505_v45 = vld [vmem:[%s748_s2 + $0x148] sm:$0xff] }
  0x19   : > { %323 = vmatpush.msra.mxu3 %v489_v23  ;;  %360 = vmatpush.msra.mxu0 %v510_v40  ;;  %v504_v46 = vld [vmem:[%s748_s2 + $0x140] sm:$0xff]  ;;  %v503_v47 = vld [vmem:[%s748_s2 + $0x138] sm:$0xff]  ;;  %v502_v48 = vld [vmem:[%s748_s2 + $0x130] sm:$0xff] }
  0x1a   : > { %263 = vmatpush.msra.mxu1 %v220_v9  ;;  %v501_v49 = vld [vmem:[%s748_s2 + $0x128] sm:$0xff]  ;;  %v500_v50 = vld [vmem:[%s748_s2 + $0x120] sm:$0xff]  ;;  %v499_v51 = vld [vmem:[%s748_s2 + $0x118] sm:$0xff] }
  0x1b   : > { %324 = vmatpush.msra.mxu3 %v488_v24  ;;  %361 = vmatpush.msra.mxu0 %v509_v41  ;;  %v498_v53 = vld [vmem:[%s748_s2 + $0x110] sm:$0xff]  ;;  %v497_v54 = vld [vmem:[%s748_s2 + $0x108] sm:$0xff]  ;;  %v496_v55 = vld [vmem:[%s748_s2 + $0x100] sm:$0xff] }
  0x1c   : > { %264 = vmatpush.msra.mxu1 %v219_v10  ;;  %v525_v56 = vld [vmem:[%s749_s3 + $0x1] ss:$0 sm:$0xff]  ;;  %v526_v61 = vld [vmem:[%s749_s3 + $0x2] ss:$0 sm:$0xff] }
  0x1d   : > { %325 = vmatpush.msra.mxu3 %v487_v25  ;;  %362 = vmatpush.msra.mxu0 %v508_v42 }
  0x1e   : > { %265 = vmatpush.msra.mxu1 %v218_v11 }
  0x1f   : > { %326 = vmatpush.msra.mxu3 %v486_v26  ;;  %363 = vmatpush.msra.mxu0 %v507_v43 }
  0x20   : > { %266 = vmatpush.msra.mxu1 %v217_v12 }
  0x21   : > { %327 = vmatpush.msra.mxu3 %v485_v27  ;;  %364 = vmatpush.msra.mxu0 %v506_v44 }
  0x22   : > { %267 = vmatpush.msra.mxu1 %v216_v13 }
  0x23   : > { %328 = vmatpush.msra.mxu3 %v484_v28  ;;  %365 = vmatpush.msra.mxu0 %v505_v45 }
  0x24   : > { %268 = vmatpush.msra.mxu1 %v215_v14 }
  0x25   : > { %329 = vmatpush.msra.mxu3 %v483_v29  ;;  %366 = vmatpush.msra.mxu0 %v504_v46 }
  0x26   : > { %269 = vmatpush.msra.mxu1 %v214_v15 }
  0x27   : > { %330 = vmatpush.msra.mxu3 %v482_v30  ;;  %367 = vmatpush.msra.mxu0 %v503_v47 }
  0x28   : > { %270 = vmatpush.msra.mxu1 %v213_v16 }
  0x29   : > { %331 = vmatpush.msra.mxu3 %v481_v31  ;;  %368 = vmatpush.msra.mxu0 %v502_v48 }
  0x2a   : > { %271 = vmatpush.msra.mxu1 %v212_v17 }
  0x2b   : > { %332 = vmatpush.msra.mxu3 %v480_v33  ;;  %369 = vmatpush.msra.mxu0 %v501_v49 }
  0x2d   : > { %333 = vmatpush.msra.mxu3 %v479_v35  ;;  %370 = vmatpush.msra.mxu0 %v500_v50 }
  0x2f   : > { %334 = vmatpush.msra.mxu3 %v478_v38  ;;  %371 = vmatpush.msra.mxu0 %v499_v51 }
  0x31   : > { %372 = vmatpush.msra.mxu0 %v498_v53 }
  0x33   : > { %373 = vmatpush.msra.mxu0 %v497_v54 }
  0x35   : > { %374 = vmatpush.msra.mxu0 %v496_v55 }
  0x93   : > { %v250_v18 = vpop.f32.mrf.mxu2 }
  0x94   : > { %272 = vmatmul.f32.vlgmr.msra.gmra.mxu1 %v250_v18 }
 0x111   : > { %v273_v34 = vpop.f32.mrf.mxu1 }
 0x112   : > { %v274_v36 = vadd.f32 %v524_v32, %v273_v34 }
 0x114   : > { %v276_v37 = vmax.f32 %v274_v36, 0.0 }
 0x116   : > { %311 = vmatpush.msrb.mxu2 %v276_v37 }
 0x117   : > { %495 = vmatmul.msk.f32.vlgmr.msrb.gmra.mxu2 %vm229_vm0, %v590_v5 }
 0x19a   : > { %v313_v52 = vpop.f32.mrf.mxu2 }
 0x19b   : > { %335 = vmatmul.f32.vlgmr.msra.gmra.mxu3 %v313_v52 }
 0x21e   : > { %v336_v57 = vpop.f32.mrf.mxu3 }
 0x21f   : > { %v337_v58 = vadd.f32 %v525_v56, %v336_v57 }
 0x221   : > { %v339_v59 = vmax.f32 %v337_v58, 0.0 }
 0x223   : > { %375 = vmatmul.f32.vlgmr.msra.gmra.mxu0 %v339_v59 }
 0x2a0   : > { %v376_v60 = vpop.f32.mrf.mxu0 }
 0x2a1   : > { %397 = vmatpush.msra.mxu2 %v376_v60 }
 0x2a2   : > { %513 = vmatmul.msk.f32.vlgmr.msra.gmra.mxu2 %vm229_vm0, %v590_v5 }
 0x325   : > { %v399_v62 = vpop.f32.mrf.mxu2 }
 0x326   : > { %v400_v63 = vadd.f32 %v526_v61, %v399_v62 }
 0x328   : > { %v402_v0 = vmax.f32 %v400_v63, 0.0 }
 0x32a   : > { %403 = vst [vmem:[%s209_s6] sm:$0xff] %v402_v0 }
 0x32b PF: > { %s14_s15 = sadd.s32 1, %s533_s15  }
 0x32c   : > { %p11_p4 = scmp.ge.s32.totalorder %s14_s15, 4  }
 0x32e   :  { %13 = sbr.rel (!%p11_p4) target bundleno = 1 (0x1), region = 73 }

</bundles_post_ra>
